<compile_context>
chip_gen: v7x
topology: tpu7x:2x2x1
jax: 0.10.0
libtpu: 0.0.40
codegen_flags: <defaults>
</compile_context>

<pallas_src>
import math

import jax
import jax.numpy as jnp
from jax.experimental import pallas as pl
from jax.experimental.pallas import tpu as pltpu

# TODO(synk): FrozenModel's freeze/thaw logic (requires_grad bookkeeping) has no
# forward-pass compute and therefore no Pallas equivalent; only the base_model
# forward is kernelized.

_LANE = 128
_SUBLANE = 8


def _round_up(n: int, m: int) -> int:
    return ((n + m - 1) // m) * m


def _choose_tile(n_rows: int, max_rows: int) -> int:
    """Pick a sublane-aligned (multiple-of-8) row tile, capped at max_rows.

    Keeps the 1-D batch grid at >= 2 steps when there is enough work so the
    batch axis splits across both v7x TensorCores; neutral on 1-TC chips.
    """
    max_rows = max(1, max_rows)
    tb = _round_up(min(max_rows, n_rows), _SUBLANE)
    if n_rows > tb:
        return tb                                        # already >= 2 grid steps
    if n_rows >= 2 * _SUBLANE:                           # enough rows to split
        tb = _round_up(pl.cdiv(n_rows, 2), _SUBLANE)
    return tb


def _pack_factor(d_in: int, d_out: int) -> int:
    """Smallest p such that p*d_in and p*d_out are both multiples of 128."""
    p_in = _LANE // math.gcd(d_in, _LANE)
    p_out = _LANE // math.gcd(d_out, _LANE)
    return math.lcm(p_in, p_out)


def _fused_mlp_kernel(x_ref, w1_ref, b1_ref, w2_ref, b2_ref, o_ref):
    """Fused Linear -> ReLU -> Linear on one batch tile.

    All operands are f32; both matmuls accumulate in f32 on the MXU and the
    bias add / ReLU run on the VPU.
    """
    x = x_ref[...]
    h = jnp.dot(x, w1_ref[...], preferred_element_type=jnp.float32) + b1_ref[...]
    h = jnp.maximum(h, 0.0)
    y = jnp.dot(h, w2_ref[...], preferred_element_type=jnp.float32) + b2_ref[...]
    o_ref[...] = y.astype(o_ref.dtype)


def _run_mlp(x, w1, b1, w2, b2, tile_rows):
    """pallas_call over the batch axis; partial last block handled by Pallas."""
    n_rows, d_in = x.shape
    h_dim = w1.shape[1]
    d_out = w2.shape[1]
    grid = (pl.cdiv(n_rows, tile_rows),)
    return pl.pallas_call(
        _fused_mlp_kernel,
        out_shape=jax.ShapeDtypeStruct((n_rows, d_out), x.dtype),
        grid=grid,
        in_specs=[
            # streamed over the batch grid (double-buffered by the pipeline)
            pl.BlockSpec((tile_rows, d_in), lambda i: (i, 0)),
            # weights / biases: constant index maps -> resident in VMEM
            pl.BlockSpec((d_in, h_dim), lambda i: (0, 0)),
            pl.BlockSpec((1, h_dim), lambda i: (0, 0)),
            pl.BlockSpec((h_dim, d_out), lambda i: (0, 0)),
            pl.BlockSpec((1, d_out), lambda i: (0, 0)),
        ],
        out_specs=pl.BlockSpec((tile_rows, d_out), lambda i: (i, 0)),
        compiler_params=pltpu.CompilerParams(
            dimension_semantics=("parallel",)),
    )(x, w1, b1, w2, b2)


def frozen_model_forward(x, w1, b1, w2, b2, *, block_b: int = 8192):
    """Pallas-backed forward of FrozenModel(Sequential(Linear, ReLU, Linear)).

    x  : [B, D_in]   float32
    w1 : [D_in, H]   float32   (PyTorch Linear weight, transposed)
    b1 : [1, H]      float32
    w2 : [H, D_out]  float32
    b2 : [1, D_out]  float32
    returns [B, D_out] float32

    block_b: batch rows per grid step (always rounded to a sublane multiple).
    The kernel is HBM-bandwidth bound; large tiles amortize per-step overhead
    while VMEM stays at a few MiB even at the default.
    """
    B, D_in = x.shape
    H = w1.shape[1]
    D_out = w2.shape[1]
    dtype = x.dtype

    pack = _pack_factor(D_in, D_out)
    # Block-diagonal weights blow up by pack^2; only keep them resident while small.
    bd_bytes = pack * pack * (D_in * H + H * D_out) * x.dtype.itemsize
    use_packed = (pack > 1 and B % pack == 0 and B >= pack
                  and bd_bytes <= 8 * 1024 * 1024)

    if use_packed:
        # Lane-packing: view `pack` consecutive batch rows as one lane-dense
        # row (free row-major reshape, zero extra HBM bytes) and apply pack-way
        # block-diagonal weights so each 128-lane segment sees its own batch
        # row.  Exact: the off-diagonal zero blocks contribute nothing.
        eye = jnp.eye(pack, dtype=dtype)
        w1_bd = jnp.kron(eye, w1)                    # [pack*D_in, pack*H]
        w2_bd = jnp.kron(eye, w2)                    # [pack*H, pack*D_out]
        b1_t = jnp.tile(b1, (1, pack))               # [1, pack*H]
        b2_t = jnp.tile(b2, (1, pack))               # [1, pack*D_out]
        # (Under jit with static weights the block-diag build constant-folds;
        # it is a tiny one-time cost either way.)
        xp = x.reshape(B // pack, pack * D_in)       # free view, lane-dense rows
        tile_rows = _choose_tile(B // pack, max(1, block_b // pack))
        out = _run_mlp(xp, w1_bd, b1_t, w2_bd, b2_t, tile_rows)
        return out.reshape(B, D_out)                 # free view back to [B, D_out]

    # Direct path: feature dims equal the full array dims (legal BlockSpec even
    # when < 128); output is written straight to [B, D_out] with no padding, no
    # wrapper jnp.pad, and a Pallas-handled partial last batch block.
    tile_rows = _choose_tile(B, block_b)
    return _run_mlp(x, w1, b1, w2, b2, tile_rows)


def _reference_forward(x, w1, b1, w2, b2):
    h = jnp.maximum(x @ w1 + b1, 0.0)
    return h @ w2 + b2


if __name__ == "__main__":
    # Small shapes consistent with the forward: features 32 -> 64 -> 32.
    B, D_IN, H, D_OUT = 8, 32, 64, 32

    key = jax.random.PRNGKey(0)
    kx, k1, kb1, k2, kb2 = jax.random.split(key, 5)

    # Deterministic synthetic parameters (mirror nn.Linear shapes, transposed).
    x = jax.random.normal(kx, (B, D_IN), dtype=jnp.float32)
    w1 = jax.random.normal(k1, (D_IN, H), dtype=jnp.float32) * 0.1
    b1 = jax.random.normal(kb1, (1, H), dtype=jnp.float32) * 0.1
    w2 = jax.random.normal(k2, (H, D_OUT), dtype=jnp.float32) * 0.1
    b2 = jax.random.normal(kb2, (1, D_OUT), dtype=jnp.float32) * 0.1

    # Check 1: B multiple of the pack factor -> lane-packed path, single step.
    y = frozen_model_forward(x, w1, b1, w2, b2)
    jax.block_until_ready(y)
    y_ref = _reference_forward(x, w1, b1, w2, b2)
    assert y.shape == (B, D_OUT)
    assert jnp.allclose(y, y_ref, atol=1e-4, rtol=1e-4), "mismatch vs reference (B=8, packed)"

    # Check 2: ragged batch (not a pack multiple) -> direct path, multi-step
    # grid with a Pallas partial last block (block_b=8 -> 3 steps over B=22).
    B2 = 22
    x2 = jax.random.normal(jax.random.PRNGKey(1), (B2, D_IN), dtype=jnp.float32)
    y2 = frozen_model_forward(x2, w1, b1, w2, b2, block_b=8)
    jax.block_until_ready(y2)
    y2_ref = _reference_forward(x2, w1, b1, w2, b2)
    assert y2.shape == (B2, D_OUT)
    assert jnp.allclose(y2, y2_ref, atol=1e-4, rtol=1e-4), "mismatch vs reference (B=22, direct)"

    # Check 3: packed path with a multi-step batch grid (B=64, block_b=16 -> 2 steps).
    B3 = 64
    x3 = jax.random.normal(jax.random.PRNGKey(2), (B3, D_IN), dtype=jnp.float32)
    y3 = frozen_model_forward(x3, w1, b1, w2, b2, block_b=16)
    jax.block_until_ready(y3)
    y3_ref = _reference_forward(x3, w1, b1, w2, b2)
    assert y3.shape == (B3, D_OUT)
    assert jnp.allclose(y3, y3_ref, atol=1e-4, rtol=1e-4), "mismatch vs reference (B=64, packed multi-step)"

    print("KERNEL_OK")
</pallas_src>

<mosaic_0001>
module attributes {stable_mosaic.version = 11 : i64} {
  func.func @_fused_mlp_kernel(%arg0: i32, %arg1: memref<8x128xf32, #tpu.memory_space<vmem>>, %arg2: memref<128x256xf32, #tpu.memory_space<vmem>>, %arg3: memref<1x256xf32, #tpu.memory_space<vmem>>, %arg4: memref<256x128xf32, #tpu.memory_space<vmem>>, %arg5: memref<1x128xf32, #tpu.memory_space<vmem>>, %arg6: memref<8x128xf32, #tpu.memory_space<vmem>>) attributes {dimension_semantics = [#tpu.dimension_semantics<parallel>], iteration_bounds = array<i64: 1>, scalar_prefetch = 0 : i64, scratch_operands = 0 : i64, tpu.core_type = #tpu.core_type<tc>, window_params = [{transform_indices = @transform_0, window_bounds = array<i64: 8, 128>}, {pipeline_mode = #tpu.pipeline_mode<synchronous>, transform_indices = @transform_1, window_bounds = array<i64: 128, 256>}, {pipeline_mode = #tpu.pipeline_mode<synchronous>, transform_indices = @transform_2, window_bounds = array<i64: 1, 256>}, {pipeline_mode = #tpu.pipeline_mode<synchronous>, transform_indices = @transform_3, window_bounds = array<i64: 256, 128>}, {pipeline_mode = #tpu.pipeline_mode<synchronous>, transform_indices = @transform_4, window_bounds = array<i64: 1, 128>}, {transform_indices = @transform_5, window_bounds = array<i64: 8, 128>}]} {
    %c0 = arith.constant 0 : index
    %c0_0 = arith.constant 0 : index
    %0 = vector.load %arg1[%c0, %c0_0] : memref<8x128xf32, #tpu.memory_space<vmem>>, vector<8x128xf32>
    %c0_1 = arith.constant 0 : index
    %c0_2 = arith.constant 0 : index
    %1 = vector.load %arg2[%c0_1, %c0_2] : memref<128x256xf32, #tpu.memory_space<vmem>>, vector<128x256xf32>
    %cst = arith.constant dense<0.000000e+00> : vector<8x256xf32>
    %2 = tpu.matmul %0, %1, %cst {dimension_numbers = #tpu.dot_dimension_numbers<[1], [0], [0], [1], [0, 0, 1, 1], [], []>} : vector<8x128xf32>, vector<128x256xf32>, vector<8x256xf32> -> vector<8x256xf32>
    %c0_3 = arith.constant 0 : index
    %c0_4 = arith.constant 0 : index
    %3 = vector.load %arg3[%c0_3, %c0_4] : memref<1x256xf32, #tpu.memory_space<vmem>>, vector<1x256xf32>
    %4 = vector.broadcast %3 : vector<1x256xf32> to vector<8x256xf32>
    %5 = arith.addf %2, %4 : vector<8x256xf32>
    %cst_5 = arith.constant 0.000000e+00 : f32
    %6 = vector.broadcast %cst_5 : f32 to vector<8x256xf32>
    %7 = arith.maximumf %5, %6 : vector<8x256xf32>
    %c0_6 = arith.constant 0 : index
    %c0_7 = arith.constant 0 : index
    %8 = vector.load %arg4[%c0_6, %c0_7] : memref<256x128xf32, #tpu.memory_space<vmem>>, vector<256x128xf32>
    %cst_8 = arith.constant dense<0.000000e+00> : vector<8x128xf32>
    %9 = tpu.matmul %7, %8, %cst_8 {dimension_numbers = #tpu.dot_dimension_numbers<[1], [0], [0], [1], [0, 0, 1, 1], [], []>} : vector<8x256xf32>, vector<256x128xf32>, vector<8x128xf32> -> vector<8x128xf32>
    %c0_9 = arith.constant 0 : index
    %c0_10 = arith.constant 0 : index
    %10 = vector.load %arg5[%c0_9, %c0_10] : memref<1x128xf32, #tpu.memory_space<vmem>>, vector<1x128xf32>
    %11 = vector.broadcast %10 : vector<1x128xf32> to vector<8x128xf32>
    %12 = arith.addf %9, %11 : vector<8x128xf32>
    %c0_11 = arith.constant 0 : index
    %c0_12 = arith.constant 0 : index
    %13 = vector.load %arg6[%c0_11, %c0_12] : memref<8x128xf32, #tpu.memory_space<vmem>>, vector<8x128xf32>
    tpu.vector_store %arg6[%c0_11, %c0_12], %12 {strides = array<i32>} : memref<8x128xf32, #tpu.memory_space<vmem>>, vector<8x128xf32>,
    return
  }
  func.func @transform_0(%arg0: i32) -> (i32, i32) {
    %c0_i32 = arith.constant 0 : i32
    %c0_i32_0 = arith.constant 0 : i32
    return %arg0, %c0_i32 : i32, i32
  }
  func.func @transform_1(%arg0: i32) -> (i32, i32) {
    %c0_i32 = arith.constant 0 : i32
    %c0_i32_0 = arith.constant 0 : i32
    %c0_i32_1 = arith.constant 0 : i32
    return %c0_i32, %c0_i32_0 : i32, i32
  }
  func.func @transform_2(%arg0: i32) -> (i32, i32) {
    %c0_i32 = arith.constant 0 : i32
    %c0_i32_0 = arith.constant 0 : i32
    %c0_i32_1 = arith.constant 0 : i32
    return %c0_i32, %c0_i32_0 : i32, i32
  }
  func.func @transform_3(%arg0: i32) -> (i32, i32) {
    %c0_i32 = arith.constant 0 : i32
    %c0_i32_0 = arith.constant 0 : i32
    %c0_i32_1 = arith.constant 0 : i32
    return %c0_i32, %c0_i32_0 : i32, i32
  }
  func.func @transform_4(%arg0: i32) -> (i32, i32) {
    %c0_i32 = arith.constant 0 : i32
    %c0_i32_0 = arith.constant 0 : i32
    %c0_i32_1 = arith.constant 0 : i32
    return %c0_i32, %c0_i32_0 : i32, i32
  }
  func.func @transform_5(%arg0: i32) -> (i32, i32) {
    %c0_i32 = arith.constant 0 : i32
    %c0_i32_0 = arith.constant 0 : i32
    return %arg0, %c0_i32 : i32, i32
  }
}

</mosaic_0001>

<bundles_post_ra>
// kernel: tpu_custom_call.1
= control target key start
LH: loop header
LB: loop body
LE: loop exit
PB: predicated region body
PF: predicated region fallthrough
CT: control target
= control target key end

     0   :  { %10 = vsyncpa [#allocation3], 0  ;;  %s614_s0 = inlined_call_operand.hbm [shape: f32[2,128], index: 0, kind: input, shape index: {}]   ;;  %s615_s1 = inlined_call_operand.hbm [shape: f32[128,256], index: 1, kind: input, shape index: {}]   ;;  %s616_s2 = inlined_call_operand.vmem [shape: f32[1,256], index: 2, kind: input, shape index: {}]   ;;  %s617_s3 = inlined_call_operand.hbm [shape: f32[256,128], index: 3, kind: input, shape index: {}]   ;;  %s618_s4 = inlined_call_operand.vmem [shape: f32[1,128], index: 4, kind: input, shape index: {}]   ;;  %s619_s5 = inlined_call_operand.hbm [shape: f32[2,128], index: 5, kind: output, shape index: {}]  }
   0x1   :  { %11 = vsyncpa [#allocation6], 0 }
   0x2   :  { %12 = vsyncpa [#allocation4], 0 }
   0x3   :  { %17 = vsyncadd [#allocation3], 96  ;;  %s513_s18 = smov [#allocation5]   ;;  %s419_s22 = scalar_lea.hbm %s615_s1, 4096 }
   0x4   :  { %s30_s19 = sshll.u32 %s513_s18, 4  ;;  %p420_p0 = scmp.ne.s32.totalorder %s615_s1, %s419_s22  ;;  %s31_s19 = int_to_ptr.vmem [resolvable:$true] %s30_s19 }
   0x5   :  { %p423_p1 = scmp.lt.u32.totalorder %s419_s22, %s615_s1 }
   0x7   :  { %p425_p2 = pnand %p423_p1, %p420_p0 }
   0x9   :  { %428 = shalt.err (!%p425_p2)
}
   0xa   :  { %s429_s27 = scalar_lea.vmem %s31_s19, 4096  ;;  %p434_p4 = scmp.lt.s32.totalorder %s31_s19, %s31_s19 }
   0xb   :  { %p430_p3 = scmp.ne.s32.totalorder %s31_s19, %s429_s27  ;;  %p435_p5 = scmp.lt.s32.totalorder %s429_s27, %s429_s27 }
   0xd   :  { %p436_p6 = por %p435_p5, %p434_p4 }
   0xf   :  { %p437_p7 = pnand %p436_p6, %p430_p3 }
  0x11   :  { %440 = shalt.err (!%p437_p7)
}
  0x12   :  { %s514_s28 = smov 256   ;;  %s515_s29 = smov 16  }
  0x13   :  { %36 = dma.hbm_to_vmem [thread:$0]  %s615_s1, 4096, %s31_s19, [#allocation6], %s514_s28, %s514_s28, %s515_s29  }
  0x14   :  { %s516_s7 = smov [#allocation2]   ;;  %s441_s11 = scalar_lea.hbm %s614_s0, 32 }
  0x15   :  { %s18_s8 = sshll.u32 %s516_s7, 4  ;;  %p442_p8 = scmp.ne.s32.totalorder %s614_s0, %s441_s11  ;;  %s19_s8 = int_to_ptr.vmem [resolvable:$true] %s18_s8 }
  0x16   :  { %p445_p9 = scmp.lt.u32.totalorder %s441_s11, %s614_s0 }
  0x18   :  { %p447_p10 = pnand %p445_p9, %p442_p8 }
  0x1a   :  { %450 = shalt.err (!%p447_p10)
}
  0x1b   :  { %s451_s16 = scalar_lea.vmem %s19_s8, 32  ;;  %s455_s1 = scalar_lea.vmem %s19_s8, 128 }
  0x1c   :  { %p452_p11 = scmp.ne.s32.totalorder %s19_s8, %s451_s16  ;;  %p456_p12 = scmp.lt.s32.totalorder %s19_s8, %s19_s8 }
  0x1d   :  { %p457_p13 = scmp.lt.s32.totalorder %s455_s1, %s451_s16 }
  0x1f   :  { %p458_p0 = por %p457_p13, %p456_p12 }
  0x21   :  { %p459_p1 = pnand %p458_p0, %p452_p11 }
  0x23   :  { %462 = shalt.err (!%p459_p1)
}
  0x24   :  { %s517_s17 = smov 32   ;;  %s518_s18 = smov 2  }
  0x25   :  { %24 = dma.hbm_to_vmem [thread:$0]  %s614_s0, 32, %s19_s8, [#allocation3], %s517_s17, %s517_s17, %s518_s18  }
  0x26   :  { %s519_s21 = smov [#allocation7]   ;;  %s463_s25 = scalar_lea.hbm %s617_s3, 4096 }
  0x27   :  { %s44_s22 = sshll.u32 %s519_s21, 4  ;;  %p464_p2 = scmp.ne.s32.totalorder %s617_s3, %s463_s25  ;;  %s45_s22 = int_to_ptr.vmem [resolvable:$true] %s44_s22 }
  0x28   :  { %p467_p3 = scmp.lt.u32.totalorder %s463_s25, %s617_s3 }
  0x2a   :  { %p469_p4 = pnand %p467_p3, %p464_p2 }
  0x2c   :  { %472 = shalt.err (!%p469_p4)
}
  0x2d   :  { %s473_s30 = scalar_lea.vmem %s45_s22, 4096  ;;  %p478_p6 = scmp.lt.s32.totalorder %s45_s22, %s45_s22 }
  0x2e   :  { %p474_p5 = scmp.ne.s32.totalorder %s45_s22, %s473_s30  ;;  %p479_p7 = scmp.lt.s32.totalorder %s473_s30, %s473_s30 }
  0x30   :  { %p480_p8 = por %p479_p7, %p478_p6 }
  0x32   :  { %p481_p9 = pnand %p480_p8, %p474_p5 }
  0x34   :  { %484 = shalt.err (!%p481_p9)
}
  0x35   :  { %s520_s0 = smov 128   ;;  %s521_s6 = smov 8  }
  0x36   :  { %50 = dma.hbm_to_vmem [thread:$0]  %s617_s3, 4096, %s45_s22, [#allocation6], %s520_s0, %s520_s0, %s521_s6  }
  0x37   :  { %507 = dma.done.wait [#allocation3], 128  }
  0x38   :  { %508 = vsyncadd [#allocation3], 4294967168 }
  0x39   :  { %509 = dma.done.wait [#allocation6], 8192  }
  0x3a   :  { %510 = vsyncadd [#allocation6], 4294959104  ;;  %v522_v0 = vmov 0.0   ;;  %v64_v1 = vld [vmem:[#allocation5 + $0x8] sm:$0xff]  ;;  %v66_v2 = vld [vmem:[#allocation5 + $0x18] sm:$0xff] }
  0x3b   :  { %171 = vmatprep.mubr.f32.mxu0 %v522_v0  ;;  %v63_v3 = vld [vmem:[#allocation5] sm:$0xff]  ;;  %v344_v4 = vpack.c.bf16 %v66_v2, %v64_v1  ;;  %v65_v5 = vld [vmem:[#allocation5 + $0x10] sm:$0xff]  ;;  %v68_v6 = vld [vmem:[#allocation5 + $0x28] sm:$0xff] }
  0x3c   :  { %v70_v7 = vld [vmem:[#allocation5 + $0x38] sm:$0xff]  ;;  %v346_v8 = vpack.c.bf16 %v65_v5, %v63_v3  ;;  %v67_v10 = vld [vmem:[#allocation5 + $0x20] sm:$0xff]  ;;  %v69_v11 = vld [vmem:[#allocation5 + $0x30] sm:$0xff] }
  0x3d   :  { %v348_v9 = vpack.c.bf16 %v70_v7, %v68_v6  ;;  %v72_v12 = vld [vmem:[#allocation5 + $0x48] sm:$0xff]  ;;  %345 = vmatprep.subr.bf16.mxu0 %v344_v4  ;;  %v74_v13 = vld [vmem:[#allocation5 + $0x58] sm:$0xff]  ;;  %v350_v14 = vpack.c.bf16 %v69_v11, %v67_v10  ;;  %v71_v16 = vld [vmem:[#allocation5 + $0x40] sm:$0xff] }
  0x3e   :  { %347 = vmatpush1.bf16.msra.mxu0 %v346_v8  ;;  %v352_v15 = vpack.c.bf16 %v74_v13, %v72_v12  ;;  %v73_v17 = vld [vmem:[#allocation5 + $0x50] sm:$0xff]  ;;  %v76_v18 = vld [vmem:[#allocation5 + $0x68] sm:$0xff]  ;;  %v78_v19 = vld [vmem:[#allocation5 + $0x78] sm:$0xff] }
  0x3f   :  { %349 = vmatprep.subr.bf16.mxu0 %v348_v9  ;;  %v354_v20 = vpack.c.bf16 %v73_v17, %v71_v16  ;;  %v356_v21 = vpack.c.bf16 %v78_v19, %v76_v18  ;;  %v75_v22 = vld [vmem:[#allocation5 + $0x60] sm:$0xff]  ;;  %v77_v23 = vld [vmem:[#allocation5 + $0x70] sm:$0xff]  ;;  %v80_v24 = vld [vmem:[#allocation5 + $0x88] sm:$0xff] }
  0x40   :  { %v82_v25 = vld [vmem:[#allocation5 + $0x98] sm:$0xff]  ;;  %v79_v26 = vld [vmem:[#allocation5 + $0x80] sm:$0xff]  ;;  %v81_v27 = vld [vmem:[#allocation5 + $0x90] sm:$0xff]  ;;  %v358_v31 = vpack.c.bf16 %v77_v23, %v75_v22 }
  0x41   :  { %v196_v28 = vld [vmem:[#allocation7 + $0x80] sm:$0xff]  ;;  %v197_v29 = vld [vmem:[#allocation7 + $0x88] sm:$0xff]  ;;  %v198_v34 = vld [vmem:[#allocation7 + $0x90] sm:$0xff]  ;;  %v360_v36 = vpack.c.bf16 %v82_v25, %v80_v24  ;;  %v362_v46 = vpack.c.bf16 %v81_v27, %v79_v26 }
  0x42   :  { %351 = vmatpush1.bf16.msra.mxu0 %v350_v14  ;;  %v180_v30 = vld [vmem:[#allocation7] sm:$0xff]  ;;  %v376_v32 = vpack.c.bf16 %v197_v29, %v196_v28  ;;  %v181_v33 = vld [vmem:[#allocation7 + $0x8] sm:$0xff]  ;;  %v199_v35 = vld [vmem:[#allocation7 + $0x98] sm:$0xff] }
  0x43   :  { %353 = vmatprep.subr.bf16.mxu0 %v352_v15  ;;  %v378_v37 = vpack.c.bf16 %v181_v33, %v180_v30  ;;  %v380_v38 = vpack.c.bf16 %v199_v35, %v198_v34  ;;  %v182_v39 = vld [vmem:[#allocation7 + $0x10] sm:$0xff]  ;;  %v183_v40 = vld [vmem:[#allocation7 + $0x18] sm:$0xff]  ;;  %v200_v41 = vld [vmem:[#allocation7 + $0xa0] sm:$0xff]  ;;  %v97_v34 = vlaneseq }
  0x44   :  { %v84_v42 = vld [vmem:[#allocation5 + $0xa8] sm:$0xff]  ;;  %v86_v43 = vld [vmem:[#allocation5 + $0xb8] sm:$0xff]  ;;  %377 = vmatprep.subr.bf16.mxu1 %v376_v32  ;;  %v382_v45 = vpack.c.bf16 %v183_v40, %v182_v39  ;;  %v83_v47 = vld [vmem:[#allocation5 + $0xa0] sm:$0xff] }
  0x45   :  { %v201_v44 = vld [vmem:[#allocation7 + $0xa8] sm:$0xff]  ;;  %379 = vmatpush3.bf16.msra.mxu1 %v378_v37  ;;  %v184_v49 = vld [vmem:[#allocation7 + $0x20] sm:$0xff]  ;;  %v364_v51 = vpack.c.bf16 %v86_v43, %v84_v42  ;;  %v85_v52 = vld [vmem:[#allocation5 + $0xb0] sm:$0xff]  ;;  %v98_v35 = vshrl.u32 %v97_v34, 7 }
  0x46   :  { %355 = vmatpush1.bf16.msra.mxu0 %v354_v20  ;;  %381 = vmatprep.subr.bf16.mxu1 %v380_v38  ;;  %v384_v48 = vpack.c.bf16 %v201_v44, %v200_v41  ;;  %v185_v50 = vld [vmem:[#allocation7 + $0x28] sm:$0xff]  ;;  %v202_v53 = vld [vmem:[#allocation7 + $0xb0] sm:$0xff]  ;;  %v203_v54 = vld [vmem:[#allocation7 + $0xb8] sm:$0xff]  ;;  %v366_v58 = vpack.c.bf16 %v85_v52, %v83_v47 }
  0x47   :  { %357 = vmatprep.subr.bf16.mxu0 %v356_v21  ;;  %v88_v55 = vld [vmem:[#allocation5 + $0xc8] sm:$0xff]  ;;  %v90_v56 = vld [vmem:[#allocation5 + $0xd8] sm:$0xff]  ;;  %v386_v57 = vpack.c.bf16 %v185_v50, %v184_v49  ;;  %v87_v59 = vld [vmem:[#allocation5 + $0xc0] sm:$0xff]  ;;  %v388_v60 = vpack.c.bf16 %v203_v54, %v202_v53  ;;  %v103_v38 = vsub.s32 1, %v98_v35 }
  0x48   :  { %v186_v61 = vld [vmem:[#allocation7 + $0x30] sm:$0xff]  ;;  %v187_v62 = vld [vmem:[#allocation7 + $0x38] sm:$0xff]  ;;  %v368_v63 = vpack.c.bf16 %v90_v56, %v88_v55  ;;  %v204_v1 = vld [vmem:[#allocation7 + $0xc0] sm:$0xff] }
  0x49   :  { %383 = vmatpush3.bf16.msra.mxu1 %v382_v45  ;;  %v89_v0 = vld [vmem:[#allocation5 + $0xd0] sm:$0xff]  ;;  %v205_v2 = vld [vmem:[#allocation7 + $0xc8] sm:$0xff]  ;;  %v94_v4 = vld [vmem:[#allocation5 + $0xf8] sm:$0xff]  ;;  %v390_v5 = vpack.c.bf16 %v187_v62, %v186_v61 }
  0x4a   :  { %359 = vmatpush1.bf16.msra.mxu0 %v358_v31  ;;  %385 = vmatprep.subr.bf16.mxu1 %v384_v48  ;;  %v92_v3 = vld [vmem:[#allocation5 + $0xe8] sm:$0xff]  ;;  %v370_v6 = vpack.c.bf16 %v89_v0, %v87_v59  ;;  %v91_v7 = vld [vmem:[#allocation5 + $0xe0] sm:$0xff]  ;;  %v392_v8 = vpack.c.bf16 %v205_v2, %v204_v1  ;;  %v93_v12 = vld [vmem:[#allocation5 + $0xf0] sm:$0xff] }
  0x4b   :  { %361 = vmatprep.subr.bf16.mxu0 %v360_v36  ;;  %v188_v9 = vld [vmem:[#allocation7 + $0x40] sm:$0xff]  ;;  %v189_v10 = vld [vmem:[#allocation7 + $0x48] sm:$0xff]  ;;  %v372_v11 = vpack.c.bf16 %v94_v4, %v92_v3  ;;  %v206_v13 = vld [vmem:[#allocation7 + $0xd0] sm:$0xff]  ;;  %v374_v16 = vpack.c.bf16 %v93_v12, %v91_v7  ;;  %v99_v36 = vsub.s32 0, %v98_v35 }
  0x4c   :  { %v207_v14 = vld [vmem:[#allocation7 + $0xd8] sm:$0xff]  ;;  %v394_v15 = vpack.c.bf16 %v189_v10, %v188_v9  ;;  %v190_v18 = vld [vmem:[#allocation7 + $0x50] sm:$0xff]  ;;  %v208_v20 = vld [vmem:[#allocation7 + $0xe0] sm:$0xff] }
  0x4d   :  { %387 = vmatpush3.bf16.msra.mxu1 %v386_v57  ;;  %v396_v17 = vpack.c.bf16 %v207_v14, %v206_v13  ;;  %v191_v19 = vld [vmem:[#allocation7 + $0x58] sm:$0xff]  ;;  %v209_v21 = vld [vmem:[#allocation7 + $0xe8] sm:$0xff]  ;;  %v192_v25 = vld [vmem:[#allocation7 + $0x60] sm:$0xff] }
  0x4e   :  { %363 = vmatpush1.bf16.msra.mxu0 %v362_v46  ;;  %389 = vmatprep.subr.bf16.mxu1 %v388_v60  ;;  %v398_v22 = vpack.c.bf16 %v191_v19, %v190_v18  ;;  %v62_v23 = vld [vmem:[#allocation2] sm:$0xff]  ;;  %v400_v24 = vpack.c.bf16 %v209_v21, %v208_v20  ;;  %v193_v26 = vld [vmem:[#allocation7 + $0x68] sm:$0xff]  ;;  %v210_v28 = vld [vmem:[#allocation7 + $0xf0] sm:$0xff] }
  0x4f   :  { %365 = vmatprep.subr.bf16.mxu0 %v364_v51  ;;  %v402_v27 = vpack.c.bf16 %v193_v26, %v192_v25  ;;  %v211_v29 = vld [vmem:[#allocation7 + $0xf8] sm:$0xff]  ;;  %v194_v31 = vld [vmem:[#allocation7 + $0x70] sm:$0xff] }
  0x50   :  { %v404_v30 = vpack.c.bf16 %v211_v29, %v210_v28  ;;  %v195_v32 = vld [vmem:[#allocation7 + $0x78] sm:$0xff] }
  0x51   :  { %391 = vmatpush3.bf16.msra.mxu1 %v390_v5  ;;  %v406_v33 = vpack.c.bf16 %v195_v32, %v194_v31  ;;  %v95_v37 = vld [vmem:[%s616_s2] sm:$0x3] }
  0x52   :  { %367 = vmatpush1.bf16.msra.mxu0 %v366_v58  ;;  %393 = vmatprep.subr.bf16.mxu1 %v392_v8  ;;  %v100_v39 = vrot.slane %v95_v37, %v99_v36  ;;  %v104_v40 = vrot.slane %v95_v37, %v103_v38  ;;  %v308_v48 = vld [vmem:[%s618_s4] ss:$0 sm:$0xff] }
  0x53   :  { %369 = vmatprep.subr.bf16.mxu0 %v368_v63 }
  0x55   :  { %395 = vmatpush3.bf16.msra.mxu1 %v394_v15 }
  0x56   :  { %371 = vmatpush1.bf16.msra.mxu0 %v370_v6  ;;  %397 = vmatprep.subr.bf16.mxu1 %v396_v17 }
  0x57   :  { %373 = vmatprep.subr.bf16.mxu0 %v372_v11 }
  0x59   :  { %399 = vmatpush3.bf16.msra.mxu1 %v398_v22 }
  0x5a   :  { %375 = vmatpush1.bf16.msra.mxu0 %v374_v16  ;;  %401 = vmatprep.subr.bf16.mxu1 %v400_v24 }
  0x5d   :  { %172 = vmatmul.mubr.f32.vlgmr.msra.gmra.mrb[0].mxu0 %v62_v23  ;;  %403 = vmatpush3.bf16.msra.mxu1 %v402_v27 }
  0x5e   :  { %405 = vmatprep.subr.bf16.mxu1 %v404_v30 }
  0x61   :  { %407 = vmatpush3.bf16.msra.mxu1 %v406_v33 }
 0x130   :  { %v173_v41 = vpop.f32.mrb[0].mxu0 }
 0x131   :  { %v174_v42 = vadd.f32 %v173_v41, %v100_v39  ;;  %v175_v43 = vpop.f32.mrb[1].mxu0 }
 0x132   :  { %v176_v44 = vadd.f32 %v175_v43, %v104_v40 }
 0x133   :  { %v178_v46 = vmax.f32 %v174_v42, 0.0 }
 0x134   :  { %v179_v45 = vmax.f32 %v176_v44, 0.0 }
 0x136   :  { %283 = vmatprep.mubr.f32.mxu1 %v179_v45 }
 0x137   :  { %284 = vmatmul.mubr.f32.vlgmr.msra.gmra.mrb[0].mxu1 %v178_v46 }
 0x20a   :  { %v341_v47 = vpop.f32.mrb[0].mxu1 }
 0x20b   :  { %v342_v49 = vpop.f32.mrb[1].mxu1 }
 0x20c   :  { %v343_v50 = vadd.f32 %v342_v49, %v341_v47 }
 0x20e   :  { %v286_v51 = vadd.f32 %v343_v50, %v308_v48 }
 0x210   :  { %289 = vst [vmem:[#allocation8] sm:$0xff] %v286_v51 }
 0x211   :  { %294 = vsyncadd [#allocation4], 96  ;;  %s523_s2 = smov [#allocation8]  }
 0x212   :  { %s295_s12 = sshll.u32 %s523_s2, 4  ;;  %s296_s12 = int_to_ptr.vmem [resolvable:$true] %s295_s12 }
 0x213   :  { %s485_s13 = scalar_lea.vmem %s296_s12, 32  ;;  %s489_s14 = scalar_lea.vmem %s296_s12, 128 }
 0x214   :  { %p486_p10 = scmp.ne.s32.totalorder %s296_s12, %s485_s13  ;;  %p490_p11 = scmp.lt.s32.totalorder %s296_s12, %s296_s12 }
 0x215   :  { %p491_p12 = scmp.lt.s32.totalorder %s489_s14, %s485_s13 }
 0x217   :  { %p492_p13 = por %p491_p12, %p490_p11 }
 0x219   :  { %p493_p0 = pnand %p492_p13, %p486_p10 }
 0x21b   :  { %496 = shalt.err (!%p493_p0)
}
 0x21c   :  { %s497_s4 = scalar_lea.hbm %s619_s5, 32 }
 0x21d   :  { %p498_p1 = scmp.ne.s32.totalorder %s619_s5, %s497_s4  ;;  %p501_p2 = scmp.lt.u32.totalorder %s497_s4, %s619_s5 }
 0x21f   :  { %p503_p3 = pnand %p501_p2, %p498_p1 }
 0x221   :  { %506 = shalt.err (!%p503_p3)
}
 0x222   :  { %301 = dma.vmem_to_hbm [thread:$0]  %s296_s12, 32, %s619_s5, [#allocation4], %s517_s17, %s517_s17, %s518_s18  }
 0x223   :  { %511 = dma.done.wait [#allocation4], 128  }
 0x224   :  { %512 = vsyncadd [#allocation4], 4294967168 }
 0x225   :  { %305 = vsyncpa [#allocation3], 1 }
 0x226   :  { %306 = vsyncpa [#allocation6], 1 }
 0x227   :  { %307 = vsyncpa [#allocation4], 1 }

</bundles_post_ra>
